<compile_context>
chip_gen: v7x
topology: tpu7x:2x2x1
jax: 0.10.0
libtpu: 0.0.40
codegen_flags: <defaults>
</compile_context>

<pallas_src>
import functools

import jax
import jax.numpy as jnp
from jax.experimental import pallas as pl
from jax.experimental.pallas import tpu as pltpu


def _round_up(x, m):
    return ((x + m - 1) // m) * m


def _pick_tile(dim, granule, max_tile):
    """Largest multiple of `granule` that divides `dim` and is <= `max_tile`.

    `dim` must be a multiple of `granule` and `max_tile` >= `granule`, so the
    result always tiles `dim` exactly (no extra rounding of the padded dims).
    """
    n = dim // granule
    best = 1
    d = 1
    while d * d <= n:
        if n % d == 0:
            for c in (d, n // d):
                if c * granule <= max_tile and c > best:
                    best = c
        d += 1
    return best * granule


def _multihead_linear_kernel(x_ref, w_ref, b_ref, o_ref):
    # x_ref: (TB, TF) bf16, w_ref: (TF, TC) bf16, b_ref: (1, TC) f32,
    # o_ref: (TB, TC) f32.  The output block index depends only on (i, j), so
    # the o tile is VMEM-resident across the reduction axis k and doubles as
    # the accumulator: init with the bias at k==0, accumulate every step,
    # no finalize needed.
    @pl.when(pl.program_id(2) == 0)
    def _():
        o_ref[...] = jnp.broadcast_to(b_ref[...], o_ref.shape)

    o_ref[...] += jnp.dot(x_ref[...], w_ref[...],
                          preferred_element_type=jnp.float32)


@functools.partial(
    jax.jit, static_argnames=("n_classes_per_label", "allow_small_fastpath"))
def multihead_logits(x, w_p, b_p, n_classes_per_label,
                     allow_small_fastpath=True):
    """x: (B, F) f32; w_p: (F_pad, C_pad) bf16 padded fused weights (built once
    at init); b_p: (1, C_pad) f32 padded fused bias.
    Returns [ (B, n_i) f32 logits for each head ]."""
    B, F = x.shape
    F_pad, C_pad = w_p.shape
    Ctot = sum(n_classes_per_label)
    assert F <= F_pad and Ctot <= C_pad

    # Sublane-align B to 16 so bf16 x tiles are fully packed.
    B_pad = _round_up(B, 16)

    # Tile sizes: exact divisors of the (already 128-aligned) padded dims,
    # sized toward the VMEM budget but v7x-safe (~16 MiB double-buffered max).
    TB = _pick_tile(B_pad, 16, 512)
    TF = _pick_tile(F_pad, 128, 2048)
    TC = _pick_tile(C_pad, 128, 1024)
    # v7x megacore: if the batch axis has a single block, ensure the class
    # ("parallel") axis has >= 2 blocks so the second TensorCore gets work.
    if B_pad // TB == 1 and C_pad // TC == 1 and C_pad >= 256:
        TC = _pick_tile(C_pad, 128, C_pad // 2)

    grid = (B_pad // TB, C_pad // TC, F_pad // TF)

    if allow_small_fastpath and grid == (1, 1, 1):
        # Single-tile problem: pallas_call fixed overhead + pad copies dominate;
        # a plain XLA dot (same bf16-stream / f32-acc numerics) is faster.
        out = jnp.dot(x.astype(jnp.bfloat16), w_p[:F, :Ctot],
                      preferred_element_type=jnp.float32) + b_p[:, :Ctot]
    else:
        # Per-call x prep only; skip the pad copy entirely when aligned.
        x_bf16 = x.astype(jnp.bfloat16)
        if B_pad == B and F_pad == F:
            x_p = x_bf16
        else:
            x_p = jnp.zeros((B_pad, F_pad), jnp.bfloat16).at[:B, :F].set(x_bf16)

        flops = 2 * B_pad * F_pad * C_pad
        bytes_accessed = (B_pad * F_pad * 2                      # x (bf16)
                          + (B_pad // TB) * F_pad * C_pad * 2    # W per batch tile
                          + B_pad * C_pad * 4                    # out (f32)
                          + C_pad * 4)                           # bias (f32)

        out = pl.pallas_call(
            _multihead_linear_kernel,
            out_shape=jax.ShapeDtypeStruct((B_pad, C_pad), jnp.float32),
            grid_spec=pltpu.PrefetchScalarGridSpec(
                num_scalar_prefetch=0,
                grid=grid,
                in_specs=[
                    pl.BlockSpec((TB, TF), lambda i, j, k: (i, k)),
                    pl.BlockSpec((TF, TC), lambda i, j, k: (k, j)),
                    pl.BlockSpec((1, TC), lambda i, j, k: (0, j)),
                ],
                out_specs=pl.BlockSpec((TB, TC), lambda i, j, k: (i, j)),
            ),
            compiler_params=pltpu.CompilerParams(
                dimension_semantics=("parallel", "parallel", "arbitrary"),
            ),
            cost_estimate=pl.CostEstimate(
                flops=flops, transcendentals=0, bytes_accessed=bytes_accessed),
        )(x_p, w_p, b_p)
        out = out[:B, :Ctot]

    # Split the fused logits back into the per-head list (PyTorch contract).
    logits = []
    off = 0
    for n in n_classes_per_label:
        logits.append(out[:, off:off + n])
        off += n
    return logits


def init_params(key, feat_dim, n_classes_per_label):
    """Matches the PyTorch init (W ~ N(0, 0.01), b = 0) and pre-builds the
    fused, 128-padded, bf16 weight ONCE (hoisted out of the per-call path).
    W_i is stored transposed (feat_dim, n_i) so the kernel computes x @ W_i.T
    directly; heads are concatenated along the class axis."""
    weights = []
    for i, n in enumerate(n_classes_per_label):
        k = jax.random.fold_in(key, i)
        weights.append(0.01 * jax.random.normal(k, (feat_dim, n), jnp.float32))
    w_cat = jnp.concatenate(weights, axis=1)
    Ctot = w_cat.shape[1]
    b_cat = jnp.zeros((1, Ctot), jnp.float32)

    F_pad = _round_up(feat_dim, 128)
    C_pad = _round_up(Ctot, 128)
    w_p = jnp.zeros((F_pad, C_pad), jnp.bfloat16).at[:feat_dim, :Ctot].set(
        w_cat.astype(jnp.bfloat16))
    b_p = jnp.zeros((1, C_pad), jnp.float32).at[:, :Ctot].set(b_cat)
    return w_p, b_p, w_cat, b_cat


if __name__ == "__main__":
    key = jax.random.PRNGKey(0)

    batch = 8
    feat_dim = 32
    n_classes_per_label = (3, 5, 7)

    kx, kw = jax.random.split(key)
    x = jax.random.normal(kx, (batch, feat_dim), dtype=jnp.float32)
    w_p, b_p, w_cat, b_cat = init_params(kw, feat_dim, n_classes_per_label)

    # Disable the small-problem fast path so the Pallas kernel is exercised.
    outs = multihead_logits(x, w_p, b_p, n_classes_per_label,
                            allow_small_fastpath=False)
    outs = jax.block_until_ready(outs)

    # Reference 1: consistent with the kernel's bf16-stream / f32-acc path.
    ref_exact = (x.astype(jnp.bfloat16).astype(jnp.float32)
                 @ w_cat.astype(jnp.bfloat16).astype(jnp.float32)) + b_cat
    # Reference 2: full-f32 reference (loose tolerance covers bf16 rounding).
    ref_f32 = x @ w_cat + b_cat

    off = 0
    for o, n in zip(outs, n_classes_per_label):
        assert o.shape == (batch, n)
        assert jnp.allclose(o, ref_exact[:, off:off + n], atol=1e-5, rtol=1e-5)
        assert jnp.allclose(o, ref_f32[:, off:off + n], atol=5e-3, rtol=5e-2)
        off += n

    print("KERNEL_OK")
</pallas_src>

<mosaic_0001>
module attributes {stable_mosaic.version = 11 : i64} {
  func.func @_multihead_linear_kernel(%arg0: i32, %arg1: i32, %arg2: i32, %arg3: memref<16x128xbf16, #tpu.memory_space<vmem>>, %arg4: memref<128x128xbf16, #tpu.memory_space<vmem>>, %arg5: memref<1x128xf32, #tpu.memory_space<vmem>>, %arg6: memref<16x128xf32, #tpu.memory_space<vmem>>) attributes {dimension_semantics = [#tpu.dimension_semantics<parallel>, #tpu.dimension_semantics<parallel>, #tpu.dimension_semantics<arbitrary>], iteration_bounds = array<i64: 1, 1, 1>, scalar_prefetch = 0 : i64, scratch_operands = 0 : i64, tpu.core_type = #tpu.core_type<tc>, window_params = [{transform_indices = @transform_0, window_bounds = array<i64: 16, 128>}, {transform_indices = @transform_1, window_bounds = array<i64: 128, 128>}, {transform_indices = @transform_2, window_bounds = array<i64: 1, 128>}, {transform_indices = @transform_3, window_bounds = array<i64: 16, 128>}]} {
    %c0_i32 = arith.constant 0 : i32
    %0 = arith.cmpi eq, %arg2, %c0_i32 : i32
    %1 = arith.extui %0 : i1 to i32
    %c0_i32_0 = arith.constant 0 : i32
    %2 = arith.cmpi ne, %1, %c0_i32_0 : i32
    scf.if %2 {
      %c0_8 = arith.constant 0 : index
      %c0_9 = arith.constant 0 : index
      %9 = vector.load %arg5[%c0_8, %c0_9] : memref<1x128xf32, #tpu.memory_space<vmem>>, vector<1x128xf32>
      %10 = vector.shape_cast %9 : vector<1x128xf32> to vector<1x128xf32>
      %11 = vector.broadcast %10 : vector<1x128xf32> to vector<16x128xf32>
      %c0_10 = arith.constant 0 : index
      %c0_11 = arith.constant 0 : index
      %12 = vector.load %arg6[%c0_10, %c0_11] : memref<16x128xf32, #tpu.memory_space<vmem>>, vector<16x128xf32>
      tpu.vector_store %arg6[%c0_10, %c0_11], %11 {strides = array<i32>} : memref<16x128xf32, #tpu.memory_space<vmem>>, vector<16x128xf32>,
    } else {
    }
    %c0 = arith.constant 0 : index
    %c0_1 = arith.constant 0 : index
    %3 = vector.load %arg6[%c0, %c0_1] : memref<16x128xf32, #tpu.memory_space<vmem>>, vector<16x128xf32>
    %c0_2 = arith.constant 0 : index
    %c0_3 = arith.constant 0 : index
    %4 = vector.load %arg3[%c0_2, %c0_3] : memref<16x128xbf16, #tpu.memory_space<vmem>>, vector<16x128xbf16>
    %c0_4 = arith.constant 0 : index
    %c0_5 = arith.constant 0 : index
    %5 = vector.load %arg4[%c0_4, %c0_5] : memref<128x128xbf16, #tpu.memory_space<vmem>>, vector<128x128xbf16>
    %cst = arith.constant dense<0.000000e+00> : vector<16x128xf32>
    %6 = tpu.matmul %4, %5, %cst {dimension_numbers = #tpu.dot_dimension_numbers<[1], [0], [0], [1], [0, 0, 1, 1], [], []>} : vector<16x128xbf16>, vector<128x128xbf16>, vector<16x128xf32> -> vector<16x128xf32>
    %7 = arith.addf %3, %6 : vector<16x128xf32>
    %c0_6 = arith.constant 0 : index
    %c0_7 = arith.constant 0 : index
    %8 = vector.load %arg6[%c0_6, %c0_7] : memref<16x128xf32, #tpu.memory_space<vmem>>, vector<16x128xf32>
    tpu.vector_store %arg6[%c0_6, %c0_7], %7 {strides = array<i32>} : memref<16x128xf32, #tpu.memory_space<vmem>>, vector<16x128xf32>,
    return
  }
  func.func @transform_0(%arg0: i32, %arg1: i32, %arg2: i32) -> (i32, i32) {
    %c0_i32 = arith.constant 0 : i32
    return %arg0, %arg2 : i32, i32
  }
  func.func @transform_1(%arg0: i32, %arg1: i32, %arg2: i32) -> (i32, i32) {
    %c0_i32 = arith.constant 0 : i32
    return %arg2, %arg1 : i32, i32
  }
  func.func @transform_2(%arg0: i32, %arg1: i32, %arg2: i32) -> (i32, i32) {
    %c0_i32 = arith.constant 0 : i32
    %c0_i32_0 = arith.constant 0 : i32
    return %c0_i32, %arg1 : i32, i32
  }
  func.func @transform_3(%arg0: i32, %arg1: i32, %arg2: i32) -> (i32, i32) {
    %c0_i32 = arith.constant 0 : i32
    return %arg0, %arg1 : i32, i32
  }
}

</mosaic_0001>

<bundles_post_ra>
// kernel: multihead_logits.1
= control target key start
LH: loop header
LB: loop body
LE: loop exit
PB: predicated region body
PF: predicated region fallthrough
CT: control target
= control target key end

     0   :  { %8 = vsyncpa [#allocation3], 0  ;;  %s243_s12 = smov [#allocation2]   ;;  %s292_s0 = inlined_call_operand.vmem [shape: bf16[16,128], index: 0, kind: input, shape index: {}]   ;;  %s293_s1 = inlined_call_operand.hbm [shape: bf16[128,128], index: 1, kind: input, shape index: {}]   ;;  %s294_s2 = inlined_call_operand.vmem [shape: f32[1,128], index: 2, kind: input, shape index: {}]   ;;  %s295_s3 = inlined_call_operand.vmem [shape: f32[16,128], index: 3, kind: output, shape index: {}]  }
   0x1   :  { %s16_s13 = sshll.u32 %s243_s12, 4  ;;  %s219_s16 = scalar_lea.hbm %s293_s1, 1024  ;;  %s17_s13 = int_to_ptr.vmem [resolvable:$true] %s16_s13 }
   0x2   :  { %p220_p0 = scmp.ne.s32.totalorder %s293_s1, %s219_s16  ;;  %p223_p1 = scmp.lt.u32.totalorder %s219_s16, %s293_s1 }
   0x4   :  { %p225_p2 = pnand %p223_p1, %p220_p0 }
   0x6   :  { %228 = shalt.err (!%p225_p2)
}
   0x7   :  { %s229_s21 = scalar_lea.vmem %s17_s13, 1024  ;;  %p234_p4 = scmp.lt.s32.totalorder %s17_s13, %s17_s13 }
   0x8   :  { %p230_p3 = scmp.ne.s32.totalorder %s17_s13, %s229_s21  ;;  %p235_p5 = scmp.lt.s32.totalorder %s229_s21, %s229_s21 }
   0xa   :  { %p236_p6 = por %p235_p5, %p234_p4 }
   0xc   :  { %p237_p7 = pnand %p236_p6, %p230_p3 }
   0xe   :  { %240 = shalt.err (!%p237_p7)
}
   0xf   :  { %s244_s22 = smov 64   ;;  %s245_s23 = smov 4  }
  0x10   :  { %22 = dma.hbm_to_vmem [thread:$0]  %s293_s1, 1024, %s17_s13, [#allocation3], %s244_s22, %s244_s22, %s245_s23  }
  0x11   :  { %241 = dma.done.wait [#allocation3], 1024  }
  0x12   :  { %242 = vsyncadd [#allocation3], 4294966272  ;;  %v246_v0 = vmov 0.0   ;;  %vm247_vm0 = vmmov 0   ;;  %v210_v1 = vld [vmem:[#allocation2] sm:$0xff]   ;;  %v211_v2 = vld [vmem:[#allocation2 + $0x8] sm:$0xff]  }
  0x13   :  { %185 = vmatprep.subr.bf16.mxu0 %v246_v0  ;;  %201 = vmatprep.mubr.msk.bf16.mxu0 %vm247_vm0, %v246_v0  ;;  %v212_v3 = vld [vmem:[#allocation2 + $0x10] sm:$0xff]   ;;  %v213_v4 = vld [vmem:[#allocation2 + $0x18] sm:$0xff]   ;;  %v214_v5 = vld [vmem:[#allocation2 + $0x20] sm:$0xff]  }
  0x14   :  { %186 = vmatpush3.bf16.msra.mxu0 %v210_v1  ;;  %v215_v6 = vld [vmem:[#allocation2 + $0x28] sm:$0xff]   ;;  %v216_v7 = vld [vmem:[#allocation2 + $0x30] sm:$0xff]   ;;  %v217_v8 = vld [vmem:[#allocation2 + $0x38] sm:$0xff]  }
  0x15   :  { %187 = vmatprep.subr.bf16.mxu0 %v246_v0  ;;  %v218_v9 = vld [vmem:[%s292_s0] sm:$0xff]  }
  0x16   :  { %v166_v10 = vld [vmem:[%s294_s2] ss:$0 sm:$0xff] }
  0x18   :  { %188 = vmatpush3.bf16.msra.mxu0 %v211_v2 }
  0x19   :  { %189 = vmatprep.subr.bf16.mxu0 %v246_v0 }
  0x1c   :  { %190 = vmatpush3.bf16.msra.mxu0 %v212_v3 }
  0x1d   :  { %191 = vmatprep.subr.bf16.mxu0 %v246_v0 }
  0x20   :  { %192 = vmatpush3.bf16.msra.mxu0 %v213_v4 }
  0x21   :  { %193 = vmatprep.subr.bf16.mxu0 %v246_v0 }
  0x24   :  { %194 = vmatpush3.bf16.msra.mxu0 %v214_v5 }
  0x25   :  { %195 = vmatprep.subr.bf16.mxu0 %v246_v0 }
  0x28   :  { %196 = vmatpush3.bf16.msra.mxu0 %v215_v6 }
  0x29   :  { %197 = vmatprep.subr.bf16.mxu0 %v246_v0 }
  0x2c   :  { %198 = vmatpush3.bf16.msra.mxu0 %v216_v7 }
  0x2d   :  { %199 = vmatprep.subr.bf16.mxu0 %v246_v0 }
  0x30   :  { %200 = vmatpush3.bf16.msra.mxu0 %v217_v8 }
  0x33   :  { %202 = vmatmul.mubr.bf16.vlgmr.msra.gmra.mrb[0].mxu0 %v218_v9 }
 0x106   :  { %v150_v11 = vpop.f32.mrb[0].mxu0 }
 0x107   :  { %v157_v12 = vadd.f32 %v166_v10, %v150_v11  ;;  %v203_v13 = vpop.f32.mrb[1].mxu0 }
 0x108   :  { %v153_v14 = vpop.f32.mrb[2].mxu0 }
 0x109   :  { %159 = vst [vmem:[%s295_s3] sm:$0xff] %v157_v12  ;;  %v158_v15 = vadd.f32 %v166_v10, %v153_v14  ;;  %v204_v16 = vpop.f32.mrb[3].mxu0 }
 0x10b   :  { %160 = vst [vmem:[%s295_s3 + $0x8] sm:$0xff] %v158_v15 }
 0x10c   :  { %165 = vsyncpa [#allocation3], 1 }

</bundles_post_ra>
